<compile_context>
chip_gen: v6e
topology: v6e:2x2x1
jax: 0.10.0
libtpu: 0.0.40
codegen_flags: <defaults>
</compile_context>

<pallas_src>
import functools

import jax
import jax.numpy as jnp
from jax.experimental import pallas as pl
from jax.experimental.pallas import tpu as pltpu

LANES = 128
SUBLANES = 8
DEFAULT_BLOCK_ROWS = 1024   # (1024,128) f32 = 512 KiB/tile -> 2 MiB double-buffered x2 inputs
NCORES = 2                  # leading "parallel" axis: both TCs on v7x, no-op on 1-TC chips


def _round_up(x, m):
    return (x + m - 1) // m * m


def _qfocal_kernel(pred_ref, true_ref, out_ref, *,
                   gamma, alpha, n_elem, block_rows, blocks_per_core):
    c = pl.program_id(0)            # "parallel" core-split axis
    i = pl.program_id(1)            # "arbitrary" reduction axis (last, by convention)

    @pl.when(i == 0)
    def _():
        out_ref[...] = jnp.zeros_like(out_ref)

    x = pred_ref[...].astype(jnp.float32)
    y = true_ref[...].astype(jnp.float32)

    # Numerically stable BCE-with-logits; exp(-|x|) is shared with the sigmoid.
    e = jnp.exp(-jnp.abs(x))                        # single EUP exp per element
    bce = jnp.maximum(x, 0.0) - x * y + jnp.log1p(e)
    p = jnp.where(x >= 0.0, 1.0, e) / (1.0 + e)     # == sigmoid(x), reuses e

    alpha_factor = y * alpha + (1.0 - y) * (1.0 - alpha)
    d = jnp.abs(y - p)
    if gamma == 1.5:
        mod = d * jnp.sqrt(d)                       # d**1.5 without exp/log pair
    elif gamma == 2.0:
        mod = d * d
    elif gamma == 1.0:
        mod = d
    else:
        mod = jnp.power(d, gamma)
    loss = bce * alpha_factor * mod                 # (block_rows, LANES) f32

    def accum(vals):
        # VPU-only fold of the big tile into the resident (8,128) output block.
        out_ref[...] += vals.reshape(-1, SUBLANES, LANES).sum(axis=0)

    block_elems = block_rows * LANES
    blk = c * blocks_per_core + i                   # intended global block id
    base = blk * block_elems                        # first flat element of this block
    in_bounds = base + block_elems <= n_elem        # interior block: no masking needed

    @pl.when(in_bounds)
    def _():
        accum(loss)

    @pl.when(jnp.logical_not(in_bounds))
    def _():
        # Tail block (or a fully-past-the-end block on the second core): mask by
        # global element index so padded / out-of-range lanes contribute zero.
        row = jax.lax.broadcasted_iota(jnp.int32, (block_rows, LANES), 0)
        lane = jax.lax.broadcasted_iota(jnp.int32, (block_rows, LANES), 1)
        gidx = base + row * LANES + lane
        accum(jnp.where(gidx < n_elem, loss, 0.0))


def qfocal_loss(pred, true, gamma=1.5, alpha=0.25, reduction="mean",
                block_rows=DEFAULT_BLOCK_ROWS):
    """QFocalLoss with 'mean' (default) or 'sum' reduction. pred/true: same shape."""
    assert pred.shape == true.shape
    if reduction not in ("mean", "sum"):
        # TODO(synk): reduction='none' would need an elementwise-output variant.
        raise NotImplementedError("only 'mean' and 'sum' reductions are implemented")

    n_elem = pred.size
    pred_f = pred.reshape(-1)
    true_f = true.reshape(-1)

    rem = n_elem % LANES
    if rem:  # only the ragged lane tail is padded; it is masked out in-kernel
        pred_f = jnp.pad(pred_f, (0, LANES - rem))
        true_f = jnp.pad(true_f, (0, LANES - rem))

    rows = pred_f.size // LANES
    pred2 = pred_f.reshape(rows, LANES)   # lane-dense slab, native dtype
    true2 = true_f.reshape(rows, LANES)

    # Block rows: big by default, shrunk (to a multiple of 16 for bf16 packing)
    # for small inputs so we don't allocate pointlessly large VMEM buffers.
    block_rows = min(int(block_rows), _round_up(rows, 2 * SUBLANES))
    total_blocks = pl.cdiv(rows, block_rows)
    blocks_per_core = pl.cdiv(total_blocks, NCORES)
    last_block = total_blocks - 1

    def in_map(c, i):
        # Clamp so we never request a block fully past the array; the in-kernel
        # index mask zeroes any contribution from such duplicated blocks.
        return (jnp.minimum(c * blocks_per_core + i, last_block), 0)

    in_spec = pl.BlockSpec((block_rows, LANES), in_map)
    out_spec = pl.BlockSpec((SUBLANES, LANES), lambda c, i: (c, 0))

    kernel = functools.partial(
        _qfocal_kernel, gamma=float(gamma), alpha=float(alpha),
        n_elem=int(n_elem), block_rows=int(block_rows),
        blocks_per_core=int(blocks_per_core))

    partials = pl.pallas_call(
        kernel,
        out_shape=jax.ShapeDtypeStruct((NCORES * SUBLANES, LANES), jnp.float32),
        grid_spec=pltpu.PrefetchScalarGridSpec(
            num_scalar_prefetch=0,
            grid=(NCORES, blocks_per_core),
            in_specs=[in_spec, in_spec],
            out_specs=out_spec,
        ),
        compiler_params=pltpu.CompilerParams(
            dimension_semantics=("parallel", "arbitrary")),
    )(pred2, true2)

    total = jnp.sum(partials)          # one tiny (16,128) reduce outside the kernel
    if reduction == "mean":
        return total / n_elem
    return total


def qfocal_loss_ref(pred, true, gamma=1.5, alpha=0.25):
    x = pred.astype(jnp.float32)
    y = true.astype(jnp.float32)
    bce = jnp.maximum(x, 0.0) - x * y + jnp.log1p(jnp.exp(-jnp.abs(x)))
    p = jax.nn.sigmoid(x)
    af = y * alpha + (1.0 - y) * (1.0 - alpha)
    mf = jnp.abs(y - p) ** gamma
    return jnp.mean(bce * af * mf)


if __name__ == "__main__":
    key = jax.random.PRNGKey(0)
    k1, k2 = jax.random.split(key)
    # typical detection-head shape: (batch, channels, H, W) logits / soft targets
    pred = jax.random.normal(k1, (2, 4, 16, 16), dtype=jnp.float32)
    true = jax.random.uniform(k2, (2, 4, 16, 16), dtype=jnp.float32)

    out = qfocal_loss(pred, true, gamma=1.5, alpha=0.25)
    out = jax.block_until_ready(out)

    ref = qfocal_loss_ref(pred, true, gamma=1.5, alpha=0.25)
    assert jnp.allclose(out, ref, rtol=1e-4, atol=1e-6), (out, ref)
    print("KERNEL_OK")
</pallas_src>

<mosaic_0001>
module attributes {stable_mosaic.version = 11 : i64} {
  func.func @_qfocal_kernel(%arg0: i32, %arg1: i32, %arg2: memref<16x128xf32, #tpu.memory_space<vmem>>, %arg3: memref<16x128xf32, #tpu.memory_space<vmem>>, %arg4: memref<8x128xf32, #tpu.memory_space<vmem>>) attributes {dimension_semantics = [#tpu.dimension_semantics<parallel>, #tpu.dimension_semantics<arbitrary>], iteration_bounds = array<i64: 2, 1>, scalar_prefetch = 0 : i64, scratch_operands = 0 : i64, tpu.core_type = #tpu.core_type<tc>, window_params = [{transform_indices = @transform_0, window_bounds = array<i64: 16, 128>}, {transform_indices = @transform_1, window_bounds = array<i64: 16, 128>}, {transform_indices = @transform_2, window_bounds = array<i64: 8, 128>}]} {
    %c0_i32 = arith.constant 0 : i32
    %0 = arith.cmpi eq, %arg1, %c0_i32 : i32
    %1 = arith.extui %0 : i1 to i32
    %c0_i32_0 = arith.constant 0 : i32
    %2 = arith.cmpi ne, %1, %c0_i32_0 : i32
    scf.if %2 {
      %cst_15 = arith.constant 0.000000e+00 : f32
      %45 = vector.broadcast %cst_15 : f32 to vector<8x128xf32>
      %c0_16 = arith.constant 0 : index
      %c0_17 = arith.constant 0 : index
      %46 = vector.load %arg4[%c0_16, %c0_17] : memref<8x128xf32, #tpu.memory_space<vmem>>, vector<8x128xf32>
      tpu.vector_store %arg4[%c0_16, %c0_17], %45 {strides = array<i32>} : memref<8x128xf32, #tpu.memory_space<vmem>>, vector<8x128xf32>,
    } else {
    }
    %c0 = arith.constant 0 : index
    %c0_1 = arith.constant 0 : index
    %3 = vector.load %arg2[%c0, %c0_1] : memref<16x128xf32, #tpu.memory_space<vmem>>, vector<16x128xf32>
    %c0_2 = arith.constant 0 : index
    %c0_3 = arith.constant 0 : index
    %4 = vector.load %arg3[%c0_2, %c0_3] : memref<16x128xf32, #tpu.memory_space<vmem>>, vector<16x128xf32>
    %5 = math.absf %3 : vector<16x128xf32>
    %cst = arith.constant 0.000000e+00 : f32
    %6 = vector.broadcast %cst : f32 to vector<16x128xf32>
    %7 = arith.subf %6, %5 : vector<16x128xf32>
    %8 = math.exp %7 : vector<16x128xf32>
    %cst_4 = arith.constant 0.000000e+00 : f32
    %9 = vector.broadcast %cst_4 : f32 to vector<16x128xf32>
    %10 = arith.maximumf %3, %9 : vector<16x128xf32>
    %11 = arith.mulf %3, %4 : vector<16x128xf32>
    %12 = arith.subf %10, %11 : vector<16x128xf32>
    %13 = math.log1p %8 : vector<16x128xf32>
    %14 = arith.addf %12, %13 : vector<16x128xf32>
    %cst_5 = arith.constant 0.000000e+00 : f32
    %15 = vector.broadcast %cst_5 : f32 to vector<16x128xf32>
    %16 = arith.cmpf oge, %3, %15 : vector<16x128xf32>
    %cst_6 = arith.constant 1.000000e+00 : f32
    %17 = vector.broadcast %cst_6 : f32 to vector<16x128xf32>
    %18 = arith.select %16, %17, %8 : vector<16x128xi1>, vector<16x128xf32>
    %cst_7 = arith.constant 1.000000e+00 : f32
    %19 = vector.broadcast %cst_7 : f32 to vector<16x128xf32>
    %20 = arith.addf %19, %8 : vector<16x128xf32>
    %21 = arith.divf %18, %20 : vector<16x128xf32>
    %cst_8 = arith.constant 2.500000e-01 : f32
    %22 = vector.broadcast %cst_8 : f32 to vector<16x128xf32>
    %23 = arith.mulf %4, %22 : vector<16x128xf32>
    %cst_9 = arith.constant 1.000000e+00 : f32
    %24 = vector.broadcast %cst_9 : f32 to vector<16x128xf32>
    %25 = arith.subf %24, %4 : vector<16x128xf32>
    %cst_10 = arith.constant 7.500000e-01 : f32
    %26 = vector.broadcast %cst_10 : f32 to vector<16x128xf32>
    %27 = arith.mulf %25, %26 : vector<16x128xf32>
    %28 = arith.addf %23, %27 : vector<16x128xf32>
    %29 = arith.subf %4, %21 : vector<16x128xf32>
    %30 = math.absf %29 : vector<16x128xf32>
    %31 = math.sqrt %30 : vector<16x128xf32>
    %32 = arith.mulf %30, %31 : vector<16x128xf32>
    %33 = arith.mulf %14, %28 : vector<16x128xf32>
    %34 = arith.mulf %33, %32 : vector<16x128xf32>
    %c1_i32 = arith.constant 1 : i32
    %35 = arith.muli %arg0, %c1_i32 : i32
    %36 = arith.addi %35, %arg1 : i32
    %c2048_i32 = arith.constant 2048 : i32
    %37 = arith.muli %36, %c2048_i32 : i32
    %c2048_i32_11 = arith.constant 2048 : i32
    %38 = arith.addi %37, %c2048_i32_11 : i32
    %c2048_i32_12 = arith.constant 2048 : i32
    %39 = arith.cmpi sle, %38, %c2048_i32_12 : i32
    %40 = arith.extui %39 : i1 to i32
    %c0_i32_13 = arith.constant 0 : i32
    %41 = arith.cmpi ne, %40, %c0_i32_13 : i32
    scf.if %41 {
      %c0_15 = arith.constant 0 : index
      %c0_16 = arith.constant 0 : index
      %45 = vector.load %arg4[%c0_15, %c0_16] : memref<8x128xf32, #tpu.memory_space<vmem>>, vector<8x128xf32>
      %46 = vector.shape_cast %34 : vector<16x128xf32> to vector<2x8x128xf32>
      %cst_17 = arith.constant dense<0.000000e+00> : vector<8x128xf32>
      %47 = vector.multi_reduction <add>, %46, %cst_17 [0] : vector<2x8x128xf32> to vector<8x128xf32>
      %48 = arith.addf %45, %47 : vector<8x128xf32>
      %c0_18 = arith.constant 0 : index
      %c0_19 = arith.constant 0 : index
      %49 = vector.load %arg4[%c0_18, %c0_19] : memref<8x128xf32, #tpu.memory_space<vmem>>, vector<8x128xf32>
      tpu.vector_store %arg4[%c0_18, %c0_19], %48 {strides = array<i32>} : memref<8x128xf32, #tpu.memory_space<vmem>>, vector<8x128xf32>,
    } else {
    }
    %true = arith.constant true
    %42 = arith.xori %39, %true : i1
    %43 = arith.extui %42 : i1 to i32
    %c0_i32_14 = arith.constant 0 : i32
    %44 = arith.cmpi ne, %43, %c0_i32_14 : i32
    scf.if %44 {
      %45 = tpu.iota {dimensions = array<i32: 0>} : vector<16x128xi32>
      %46 = tpu.iota {dimensions = array<i32: 1>} : vector<16x128xi32>
      %c128_i32 = arith.constant 128 : i32
      %47 = vector.broadcast %c128_i32 : i32 to vector<16x128xi32>
      %48 = arith.muli %45, %47 : vector<16x128xi32>
      %49 = vector.broadcast %37 : i32 to vector<16x128xi32>
      %50 = arith.addi %49, %48 : vector<16x128xi32>
      %51 = arith.addi %50, %46 : vector<16x128xi32>
      %c2048_i32_15 = arith.constant 2048 : i32
      %52 = vector.broadcast %c2048_i32_15 : i32 to vector<16x128xi32>
      %53 = arith.cmpi slt, %51, %52 : vector<16x128xi32>
      %cst_16 = arith.constant 0.000000e+00 : f32
      %54 = vector.broadcast %cst_16 : f32 to vector<16x128xf32>
      %55 = arith.select %53, %34, %54 : vector<16x128xi1>, vector<16x128xf32>
      %c0_17 = arith.constant 0 : index
      %c0_18 = arith.constant 0 : index
      %56 = vector.load %arg4[%c0_17, %c0_18] : memref<8x128xf32, #tpu.memory_space<vmem>>, vector<8x128xf32>
      %57 = vector.shape_cast %55 : vector<16x128xf32> to vector<2x8x128xf32>
      %cst_19 = arith.constant dense<0.000000e+00> : vector<8x128xf32>
      %58 = vector.multi_reduction <add>, %57, %cst_19 [0] : vector<2x8x128xf32> to vector<8x128xf32>
      %59 = arith.addf %56, %58 : vector<8x128xf32>
      %c0_20 = arith.constant 0 : index
      %c0_21 = arith.constant 0 : index
      %60 = vector.load %arg4[%c0_20, %c0_21] : memref<8x128xf32, #tpu.memory_space<vmem>>, vector<8x128xf32>
      tpu.vector_store %arg4[%c0_20, %c0_21], %59 {strides = array<i32>} : memref<8x128xf32, #tpu.memory_space<vmem>>, vector<8x128xf32>,
    } else {
    }
    return
  }
  func.func @transform_0(%arg0: i32, %arg1: i32) -> (i32, i32) {
    %c1_i32 = arith.constant 1 : i32
    %0 = arith.muli %arg0, %c1_i32 : i32
    %1 = arith.addi %0, %arg1 : i32
    %c0_i32 = arith.constant 0 : i32
    %2 = arith.minsi %1, %c0_i32 : i32
    %c0_i32_0 = arith.constant 0 : i32
    %c0_i32_1 = arith.constant 0 : i32
    return %2, %c0_i32_0 : i32, i32
  }
  func.func @transform_1(%arg0: i32, %arg1: i32) -> (i32, i32) {
    %c1_i32 = arith.constant 1 : i32
    %0 = arith.muli %arg0, %c1_i32 : i32
    %1 = arith.addi %0, %arg1 : i32
    %c0_i32 = arith.constant 0 : i32
    %2 = arith.minsi %1, %c0_i32 : i32
    %c0_i32_0 = arith.constant 0 : i32
    %c0_i32_1 = arith.constant 0 : i32
    return %2, %c0_i32_0 : i32, i32
  }
  func.func @transform_2(%arg0: i32, %arg1: i32) -> (i32, i32) {
    %c0_i32 = arith.constant 0 : i32
    %c0_i32_0 = arith.constant 0 : i32
    return %arg0, %c0_i32 : i32, i32
  }
}

</mosaic_0001>

<bundles_post_ra>
// kernel: tpu_custom_call.1
= control target key start
LH: loop header
LB: loop body
LE: loop exit
PB: predicated region body
PF: predicated region fallthrough
CT: control target
= control target key end

     0   :  { %7 = vsyncpa [#allocation3], 0  ;;  %s995_s0 = inlined_call_operand.hbm [shape: f32[16,128], index: 0, kind: input, shape index: {}]   ;;  %s996_s1 = inlined_call_operand.hbm [shape: f32[16,128], index: 1, kind: input, shape index: {}]   ;;  %s997_s2 = inlined_call_operand.hbm [shape: f32[16,128], index: 2, kind: output, shape index: {}]  }
   0x1   :  { %9 = vsyncpa [#allocation3 + $0x1], 0 }
   0x2   :  { %10 = vsyncpa [#allocation6], 0 }
   0x3   :  { %12 = vsyncpa [#allocation6 + $0x1], 0 }
   0x4   :  { %13 = vsyncpa [#allocation4], 0 }
   0x5   :  { %15 = vsyncpa [#allocation4 + $0x1], 0  ;;  %s792_s9 = smov 0   ;;  %s794_s10 = smov 0  }
   0x6   :  { %s796_s11 = smov 0   ;;  %s798_s12 = smov 0  }
   0x7   :  { %s800_s13 = smov 0   ;;  %s802_s14 = smov 0  }
   0x8   :  { %s804_s15 = smov 0   ;;  %s806_s16 = smov 0  }
   0x9 LB: > { %s475_s17 = sadd.s32 4294967295, %s769_s16   ;;  %s476_s18 = sadd.s32 4294967294, %s769_s16   ;;  %s769_s16 = sphi %s806_s16, %s21_s16   ;;  %s765_s15 = sphi %s804_s15, %s1016_s15   ;;  %s761_s14 = sphi %s802_s14, %s1015_s14   ;;  %s757_s13 = sphi %s800_s13, %s985_s13   ;;  %s753_s12 = sphi %s798_s12, %s1014_s12   ;;  %s749_s11 = sphi %s796_s11, %s1013_s11   ;;  %s745_s10 = sphi %s794_s10, %s1012_s10   ;;  %s741_s9 = sphi %s792_s9, %s1011_s9  }
   0xa   : > { %s33_s19 = sadd.s32 1, %s765_s15  ;;  %p738_p1 = scmp.ne.s32.totalorder %s757_s13, 0 }
   0xb   : > { %p35_p0 = scmp.ge.s32.totalorder %s33_s19, 2  ;;  %p54_p2 = scmp.eq.s32.totalorder %s769_s16, 0 }
   0xc   : > { %p59_p3 = scmp.ne.s32.totalorder %s757_s13, %s753_s12  ;;  %p60_p5 = scmp.eq.s32.totalorder %s475_s17, 0 }
   0xd   : > { %s1018_s19 = smov (%p35_p0, %s33_s19), 0  ;;  %p838_p4 = por %p738_p1, %p54_p2 }
   0xe   : > { %p842_p6 = por %p60_p5, %p59_p3  ;;  %s101_s22 = ssub.s32 %s765_s15, %s1018_s19 }
   0xf   : > { %p102_p7 = scmp.eq.s32.totalorder %s101_s22, 0  ;;  %s104_s23 = sadd.s32 1, %s749_s11 }
  0x10   : > { %s1001_s21 = scalar_select %p842_p6, 1, 0 }
  0x11   : > { %s850_s24 = scalar_select %p102_p7, %s749_s11, %s104_s23  }
  0x12   : > { %p114_p8 = scmp.ne.s32.totalorder %s749_s11, %s745_s10  ;;  %p115_p9 = scmp.eq.s32.totalorder %s475_s17, 1 }
  0x13   : > { %p120_p10 = scmp.ne.s32.totalorder %s745_s10, %s741_s9  ;;  %p121_p11 = scmp.eq.s32.totalorder %s476_s18, 1 }
  0x14   : > { %p856_p12 = por %p115_p9, %p114_p8  ;;  %p515_p1 = scmp.lt.s32.totalorder %s769_s16, 2 }
  0x15   : > { %p861_p0 = por %p121_p11, %p120_p10  ;;  %s771_s27 = smov [#allocation2]  }
  0x16   : > { %s1002_s25 = scalar_select %p856_p12, 1, 0 }
  0x17   : > { %s1003_s26 = scalar_select %p861_p0, 1, 0 }
  0x18   : > { %s155_s28 = sshll.u32 %s771_s27, 4  ;;  %p868_p2 = pnand %p515_p1, %p838_p4  ;;  %s156_s28 = int_to_ptr.vmem [resolvable:$true] %s155_s28 }
  0x19   : > { %s608_s4 = scalar_lea.hbm %s995_s0, 256 }
  0x1a   : > { %p609_p3 = scmp.ne.s32.totalorder %s995_s0, %s608_s4  ;;  %p610_p5 = pneg %p868_p2 }
  0x1b   : > { %p615_p8 = scmp.lt.s32.totalorder %s608_s4, %s608_s4 }
  0x1c   : > { %p611_p7 = pnand %p610_p5, %p609_p3 }
  0x1e   : > { %p612_p4 = pneg %p611_p7 }
  0x20   : > { %p617_p9 = pnand %p615_p8, %p612_p4 }
  0x22   : > { %620 = shalt.err (!%p617_p9)
}
  0x23   : > { %s621_s7 = scalar_lea.vmem %s156_s28, 256  ;;  %s628_s8 = scalar_lea.vmem %s156_s28, 512 }
  0x24   : > { %p622_p10 = scmp.ne.s32.totalorder %s156_s28, %s621_s7  ;;  %p629_p13 = scmp.lt.s32.totalorder %s156_s28, %s156_s28 }
  0x25   : > { %p630_p0 = scmp.lt.s32.totalorder %s628_s8, %s621_s7 }
  0x26   : > { %p624_p11 = pnand %p622_p10, %p610_p5 }
  0x27   : > { %p631_p12 = por %p630_p0, %p629_p13 }
  0x28   : > { %p625_p1 = pneg %p624_p11 }
  0x2a   : > { %p632_p6 = pnand %p631_p12, %p625_p1 }
  0x2c   : > { %635 = shalt.err (!%p632_p6)
}
  0x2d   : > { %s772_s12 = smov 128   ;;  %s773_s17 = smov 8  }
  0x2e   : > { %507 = dma.hbm_to_vmem [thread:$0]  (!%p868_p2), %s995_s0, 256, %s156_s28, [#allocation3], %s772_s12, %s772_s12, %s773_s17  }
  0x2f   : > { %p485_p3 = scmp.ge.s32.totalorder %s769_s16, 1  ;;  %p187_p7 = scmp.lt.s32.totalorder %s769_s16, 3 }
  0x30   : > { %s774_s23 = smov [#allocation5]   ;;  %s636_s4 = scalar_lea.hbm %s996_s1, 256 }
  0x31   : > { %p893_p4 = pnand %p485_p3, %p187_p7  ;;  %s179_s27 = sshll.u32 %s774_s23, 4  ;;  %s180_s27 = int_to_ptr.vmem [resolvable:$true] %s179_s27 }
  0x32   : > { %p637_p6 = scmp.ne.s32.totalorder %s996_s1, %s636_s4  ;;  %p643_p0 = scmp.lt.s32.totalorder %s636_s4, %s636_s4 }
  0x33   : > { %s1005_s22 = scalar_select %p893_p4, 1, 0 }
  0x34   : > { %p639_p12 = pnand %p637_p6, %p610_p5 }
  0x36   : > { %p640_p13 = pneg %p639_p12 }
  0x38   : > { %p645_p8 = pnand %p643_p0, %p640_p13 }
  0x3a   : > { %648 = shalt.err (!%p645_p8)
}
  0x3b   : > { %s649_s28 = scalar_lea.vmem %s180_s27, 256  ;;  %s656_s7 = scalar_lea.vmem %s180_s27, 512 }
  0x3c   : > { %p650_p9 = scmp.ne.s32.totalorder %s180_s27, %s649_s28  ;;  %p657_p1 = scmp.lt.s32.totalorder %s180_s27, %s180_s27 }
  0x3d   : > { %p658_p3 = scmp.lt.s32.totalorder %s656_s7, %s649_s28 }
  0x3e   : > { %p652_p10 = pnand %p650_p9, %p610_p5 }
  0x3f   : > { %p659_p7 = por %p658_p3, %p657_p1 }
  0x40   : > { %p653_p11 = pneg %p652_p10 }
  0x42   : > { %p660_p4 = pnand %p659_p7, %p653_p11 }
  0x44   : > { %663 = shalt.err (!%p660_p4)
}
  0x45   : > { %510 = dma.hbm_to_vmem [thread:$0]  (!%p868_p2), %s996_s1, 256, %s180_s27, [#allocation6], %s772_s12, %s772_s12, %s773_s17  }
  0x46   : > { %p1006_p6 = scmp.ne.s32.totalorder %s1005_s22, 0 }
  0x47   : > { %s193_s20 = sand.u32 (!%p1006_p6), 1, %s757_s13   ;;  %p1007_p5 = scmp.ne.s32.totalorder (!%p1006_p6), %s1001_s21, 0 }
  0x48   : > { %191 = sbr.rel (%p1006_p6) target bundleno = 201 (0xc9), region = 28  ;;  %s486_s23 = sshll.u32 (!%p1006_p6), %s193_s20, 4 }
  0x49   : > { %s194_s30 = scalar_lea.sflag (!%p1006_p6), [#allocation3], %s193_s20  ;;  %s197_s3 = scalar_lea.vmem (!%p1006_p6), [#allocation2], %s486_s23 }
  0x4d   : > { %727 = dma.done.wait (%p1007_p5), %s194_s30, 256  }
  0x4e   : > { %729 = vsyncadd (%p1007_p5), %s194_s30, 4294967040  ;;  %s203_s29 = scalar_lea.sflag [#allocation6], %s193_s20  ;;  %s921_s4 = scalar_lea.vmem [#allocation5], %s486_s23 }
  0x4f   : > { %731 = dma.done.wait (%p1007_p5), %s203_s29, 256  }
  0x50   : > { %733 = vsyncadd (%p1007_p5), %s203_s29, 4294967040  ;;  %s229_s12 = sand.u32 1, %s745_s10   ;;  %s489_s17 = sshll.u32 %s761_s14, 11  ;;  %v775_v0 = vmov 0.0   ;;  %v245_v1 = vld [vmem:[%s197_s3] sm:$0xff]  ;;  %v246_v2 = vld [vmem:[%s197_s3 + $0x8] sm:$0xff] }
  0x51   : > { %s488_s22 = sshll.u32 %s229_s12, 3  ;;  %s933_s27 = sadd.s32 2048, %s489_s17  ;;  %v249_v3 = vand.u32 2147483647, %v245_v1  ;;  %v250_v4 = vand.u32 2147483647, %v246_v2 }
  0x52   : > { %s935_s5 = scalar_lea.vmem [#allocation7], %s488_s22  ;;  %vm283_vm0 = vcmp.ge.f32.partialorder %v245_v1, 0.0  ;;  %vm284_vm1 = vcmp.ge.f32.partialorder %v246_v2, 0.0  ;;  %v247_v16 = vld [vmem:[%s921_s4] sm:$0xff]  ;;  %v248_v18 = vld [vmem:[%s921_s4 + $0x8] sm:$0xff]  ;;  %v257_v33 = vmax.f32 %v245_v1, 0.0 }
  0x53   : > { %244 = vst [vmem:[%s935_s5] sm:$0xff] %v775_v0  ;;  %v251_v5 = vsub.f32 0.0, %v249_v3  ;;  %v252_v6 = vsub.f32 0.0, %v250_v4  ;;  %v258_v34 = vmax.f32 %v246_v2, 0.0  ;;  %v259_v35 = vmul.f32 %v247_v16, %v245_v1  ;;  %p490_p2 = scmp.gt.s32.totalorder %s933_s27, 2048 }
  0x54   : > { %v295_v36 = vsub.f32 1.0, %v247_v16  ;;  %v260_v37 = vmul.f32 %v248_v18, %v246_v2  ;;  %v296_v40 = vsub.f32 1.0, %v248_v18  ;;  %v293_v44 = vmul.f32 0.25, %v247_v16 }
  0x55   : > { %v253_v7 = vmul.f32 1.442695, %v251_v5  ;;  %v255_v8 = vmul.f32 1.442695, %v252_v6  ;;  %v261_v43 = vsub.f32 %v257_v33, %v259_v35  ;;  %v294_v48 = vmul.f32 0.25, %v248_v18 }
  0x56   : > { %v297_v45 = vmul.f32 0.75, %v295_v36  ;;  %v262_v46 = vsub.f32 %v258_v34, %v260_v37  ;;  %v298_v49 = vmul.f32 0.75, %v296_v40 }
  0x57   : > { %592 = vpow2.f32 %v253_v7 }
  0x58   : > { %594 = vpow2.f32 %v255_v8  ;;  %v299_v52 = vadd.f32 %v297_v45, %v293_v44  ;;  %v300_v55 = vadd.f32 %v298_v49, %v294_v48 }
  0x64   : > { %v593_v9 = vpop.eup %592 }
  0x65   : > { %v595_v10 = vpop.eup %594  ;;  %v263_v11 = vadd.f32 1.0, %v593_v9  ;;  %v285_v13 = vsel %vm283_vm0, 1.0, %v593_v9  ;;  %v266_v22 = vmul.f32 -0.5, %v593_v9  ;;  %v269_v29 = vand.u32 2147483647, %v593_v9 }
  0x66   : > { %v272_v12 = vadd.f32 1.0, %v595_v10  ;;  %v286_v14 = vsel %vm284_vm1, 1.0, %v595_v10  ;;  %v275_v24 = vmul.f32 -0.5, %v595_v10  ;;  %v278_v32 = vand.u32 2147483647, %v595_v10 }
  0x67   : > { %596 = vrcp.f32 %v263_v11  ;;  %v267_v27 = vadd.f32 1.0, %v266_v22  ;;  %vm270_vm2 = vcmp.lt.f32.partialorder %v269_v29, 0.0004427343 }
  0x68   : > { %598 = vrcp.f32 %v272_v12  ;;  %v276_v30 = vadd.f32 1.0, %v275_v24  ;;  %vm279_vm3 = vcmp.lt.f32.partialorder %v278_v32, 0.0004427343 }
  0x69   : > { %600 = vlog2.f32 %v263_v11  ;;  %v268_v39 = vmul.f32 %v593_v9, %v267_v27 }
  0x6a   : > { %602 = vlog2.f32 %v272_v12  ;;  %v277_v42 = vmul.f32 %v595_v10, %v276_v30 }
  0x74   : > { %v597_v15 = vpop.eup %596 }
  0x75   : > { %v599_v17 = vpop.eup %598  ;;  %v290_v19 = vmul.f32 %v597_v15, %v285_v13 }
  0x76   : > { %v292_v20 = vmul.f32 %v599_v17, %v286_v14  ;;  %v601_v28 = vpop.eup %600 }
  0x77   : > { %v301_v21 = vsub.f32 %v247_v16, %v290_v19  ;;  %v603_v31 = vpop.eup %602  ;;  %v265_v38 = vmul.f32 0.6931472, %v601_v28 }
  0x78   : > { %v302_v23 = vsub.f32 %v248_v18, %v292_v20  ;;  %v274_v41 = vmul.f32 0.6931472, %v603_v31 }
  0x79   : > { %v303_v25 = vand.u32 2147483647, %v301_v21  ;;  %v271_v47 = vsel %vm270_vm2, %v268_v39, %v265_v38 }
  0x7a   : > { %v304_v26 = vand.u32 2147483647, %v302_v23  ;;  %v280_v50 = vsel %vm279_vm3, %v277_v42, %v274_v41  ;;  %v281_v51 = vadd.f32 %v271_v47, %v261_v43 }
  0x7b   : > { %604 = vrsqrt.f32 %v303_v25  ;;  %v282_v54 = vadd.f32 %v280_v50, %v262_v46  ;;  %vm307_vm4 = vcmp.eq.f32.partialorder %v303_v25, inf  ;;  %v310_v56 = vand.u32 2147483648, %v303_v25 }
  0x7c   : > { %606 = vrsqrt.f32 %v304_v26  ;;  %vm309_vm5 = vcmp.eq.f32.partialorder %v303_v25, 0.0  ;;  %vm314_vm6 = vcmp.eq.f32.partialorder %v304_v26, inf  ;;  %v317_v59 = vand.u32 2147483648, %v304_v26 }
  0x7d   : > { %vm316_vm7 = vcmp.eq.f32.partialorder %v304_v26, 0.0  ;;  %v321_v62 = vmul.f32 %v299_v52, %v281_v51  ;;  %v322_v1 = vmul.f32 %v300_v55, %v282_v54 }
  0x88   : > { %v605_v53 = vpop.eup %604 }
  0x89   : > { %v607_v57 = vpop.eup %606  ;;  %v306_v58 = vmul.f32 %v605_v53, %v303_v25 }
  0x8a   : > { %v313_v60 = vmul.f32 %v607_v57, %v304_v26 }
  0x8b   : > { %v308_v61 = vsel %vm307_vm4, %v303_v25, %v306_v58 }
  0x8c   : > { %v311_v63 = vsel %vm309_vm5, %v310_v56, %v308_v61  ;;  %v315_v0 = vsel %vm314_vm6, %v304_v26, %v313_v60  ;;  %331 = sbr.rel (%p490_p2) target bundleno = 151 (0x97), region = 44 }
  0x8d   : > { %v318_v2 = vsel %vm316_vm7, %v317_v59, %v315_v0  ;;  %v319_v3 = vmul.f32 %v311_v63, %v303_v25 }
  0x8e   : > { %v320_v4 = vmul.f32 %v318_v2, %v304_v26 }
  0x8f   : > { %v323_v5 = vmul.f32 %v321_v62, %v319_v3 }
  0x90   : > { %v324_v6 = vmul.f32 %v322_v1, %v320_v4 }
  0x91   : > { %v332_v7 = vld [vmem:[%s935_s5] sm:$0xff] }
  0x92   : > { %v333_v8 = vadd.f32 %v324_v6, %v323_v5 }
  0x94   : > { %v334_v9 = vadd.f32 %v333_v8, %v332_v7 }
  0x96   : > { %335 = vst [vmem:[%s935_s5] sm:$0xff] %v334_v9 }
  0x97 PF: > { %p491_p4 = scmp.le.s32.totalorder %s933_s27, 2048 }
  0x99   : > { %339 = sbr.rel (%p491_p4) target bundleno = 177 (0xb1), region = 48 }
  0x9e   : > { %v340_v10 = vlaneseq  ;;  %v347_v12 = vstv %s489_s17  ;;  %v356_v23 = vld [vmem:[%s935_s5] sm:$0xff] }
  0xa0   : > { %v341_v11 = vshrl.u32 %v340_v10, 7  ;;  %v344_v14 = vand.u32 127, %v340_v10 }
  0xa2   : > { %v342_v13 = vadd.s32 8, %v341_v11  ;;  %v345_v15 = vmul.u32 128, %v341_v11 }
  0xa4   : > { %v346_v16 = vmul.u32 128, %v342_v13  ;;  %v348_v17 = vadd.s32 %v347_v12, %v345_v15 }
  0xa6   : > { %v349_v18 = vadd.s32 %v347_v12, %v346_v16  ;;  %v350_v19 = vadd.s32 %v348_v17, %v344_v14 }
  0xa8   : > { %v351_v20 = vadd.s32 %v349_v18, %v344_v14  ;;  %vm352_vm8 = vcmp.lt.s32.totalorder %v350_v19, 2048 }
  0xa9   : > { %v354_v21 = vsel %vm352_vm8, %v323_v5, 0.0 }
  0xaa   : > { %vm353_vm9 = vcmp.lt.s32.totalorder %v351_v20, 2048 }
  0xab   : > { %v355_v22 = vsel %vm353_vm9, %v324_v6, 0.0 }
  0xac   : > { %v357_v24 = vadd.f32 %v355_v22, %v354_v21 }
  0xae   : > { %v358_v25 = vadd.f32 %v357_v24, %v356_v23 }
  0xb0   : > { %359 = vst [vmem:[%s935_s5] sm:$0xff] %v358_v25 }
  0xb1 PF: > { %s493_s21 = sshll.u32 %s761_s14, 7  ;;  %s374_s8 = sshll.u32 %s935_s5, 4  ;;  %s375_s8 = int_to_ptr.vmem [resolvable:$true] %s374_s8 }
  0xb2   : > { %s372_s7 = scalar_lea.hbm %s997_s2, %s493_s21  ;;  %s361_s18 = scalar_lea.sflag [#allocation4], %s229_s12 }
  0xb3   : > { %s664_s20 = scalar_lea.vmem %s375_s8, 128  ;;  %p1008_p13 = scmp.ne.s32.totalorder %s1002_s25, 0 }
  0xb4   : > { %p665_p12 = scmp.ne.s32.totalorder %s375_s8, %s664_s20  ;;  %s776_s23 = smov [#allocation7]  }
  0xb5   : > { %s668_s30 = sshll.u32 %s776_s23, 4  ;;  %s669_s30 = int_to_ptr.vmem [resolvable:$false] %s668_s30 }
  0xb6   : > { %p666_p0 = pnand %p665_p12, %p1008_p13  ;;  %s670_s3 = scalar_lea.vmem %s669_s30, 256 }
  0xb7   : > { %p671_p9 = scmp.lt.s32.totalorder %s375_s8, %s669_s30  ;;  %p672_p10 = scmp.lt.s32.totalorder %s670_s3, %s664_s20 }
  0xb8   : > { %p667_p8 = pneg %p666_p0 }
  0xb9   : > { %p673_p11 = por %p672_p10, %p671_p9 }
  0xbb   : > { %p674_p1 = pnand %p673_p11, %p667_p8 }
  0xbd   : > { %677 = shalt.err (!%p674_p1)
}
  0xbe   : > { %s678_s14 = scalar_lea.hbm %s372_s7, 128  ;;  %s682_s12 = scalar_lea.hbm %s997_s2, 256 }
  0xbf   : > { %p679_p3 = scmp.ne.s32.totalorder %s372_s7, %s678_s14  ;;  %p683_p5 = scmp.lt.s32.totalorder %s372_s7, %s997_s2 }
  0xc0   : > { %p684_p2 = scmp.lt.s32.totalorder %s682_s12, %s678_s14 }
  0xc1   : > { %p680_p7 = pnand %p679_p3, %p1008_p13 }
  0xc2   : > { %p685_p4 = por %p684_p2, %p683_p5 }
  0xc3   : > { %p681_p6 = pneg %p680_p7 }
  0xc5   : > { %p686_p12 = pnand %p685_p4, %p681_p6 }
  0xc7   : > { %689 = shalt.err (!%p686_p12)
}
  0xc8   : > { %502 = dma.vmem_to_hbm [thread:$0]  (%p1008_p13), %s375_s8, 128, %s372_s7, %s361_s18  }
  0xc9 PF: > { %s386_s27 = sand.u32 1, %s741_s9   ;;  %p1009_p0 = scmp.ne.s32.totalorder %s1003_s26, 0 }
  0xca   : > { %p1010_p8 = scmp.ge.s32.totalorder %s769_s16, 2  ;;  %s387_s5 = scalar_lea.sflag [#allocation4], %s386_s27 }
  0xcc   : > { %p512_p9 = pnand %p1010_p8, %p1009_p0 }
  0xce   : > { %p513_p10 = pneg %p512_p9 }
  0xd0   : > { %735 = dma.done.wait (%p513_p10), %s387_s5, 128  }
  0xd1   : > { %737 = vsyncadd (%p513_p10), %s387_s5, 4294967168  ;;  %s21_s16 = sadd.s32 1, %s769_s16   ;;  %s1011_s9 = smov %s745_s10 }
  0xd2   : > { %p18_p11 = scmp.ge.s32.totalorder %s21_s16, 4   ;;  %s1012_s10 = smov %s749_s11 }
  0xd3   : > { %s1013_s11 = smov %s850_s24  ;;  %s1014_s12 = smov %s757_s13 }
  0xd4   : > { %s985_s13 = smov 0   ;;  %s1015_s14 = smov %s765_s15 }
  0xd5   : > { %s1016_s15 = smov %s1018_s19  ;;  %20 = sbr.rel (!%p18_p11) target bundleno = 9 (0x9), region = 98 }
  0xda   :  { %392 = vsyncpa [#allocation3], 1 }
  0xdb   :  { %394 = vsyncpa [#allocation3 + $0x1], 1 }
  0xdc   :  { %395 = vsyncpa [#allocation6], 1 }
  0xdd   :  { %397 = vsyncpa [#allocation6 + $0x1], 1 }
  0xde   :  { %398 = vsyncpa [#allocation4], 1 }
  0xdf   :  { %400 = vsyncpa [#allocation4 + $0x1], 1 }

</bundles_post_ra>
